<compile_context>
chip_gen: v6e
topology: v6e:2x2x1
jax: 0.10.0
libtpu: 0.0.40
codegen_flags: <defaults>
</compile_context>

<pallas_src>
import functools

import jax
import jax.numpy as jnp
from jax.experimental import pallas as pl
from jax.experimental.pallas import tpu as pltpu


def _round_up(a, b):
    return ((a + b - 1) // b) * b


def _num_tensorcores():
    """Best-effort TensorCores-per-device count (1 on v5e/v6e, 2 on v7x and
    other megacore parts).  Only gates a grid-splitting heuristic."""
    try:
        kind = jax.devices()[0].device_kind.lower()
    except Exception:
        return 1
    return 2 if any(t in kind for t in ("v7", "v5p", "v4")) else 1


def _mlp_kernel(num_layers, x_ref, *refs):
    # refs = (w0, b0, w1, b1, ..., o_ref)
    o_ref = refs[-1]
    param_refs = refs[:-1]

    # f32 tile streamed straight from HBM; cast to bf16 here (free VPU filler)
    # instead of in a separate wrapper-side XLA pass over HBM.
    h = x_ref[...].astype(jnp.bfloat16)
    for i in range(num_layers):
        w = param_refs[2 * i][...]        # bf16 (in_i, out_i), VMEM-resident
        b = param_refs[2 * i + 1][...]    # f32  (1, out_i)
        # bf16 x bf16 -> f32 accumulation on the MXU; epilogue in f32 on VPU.
        acc = jnp.dot(h, w, preferred_element_type=jnp.float32) + b
        if i < num_layers - 1:
            h = jnp.maximum(acc, 0.0).astype(jnp.bfloat16)   # F.relu
        else:
            h = acc                                          # last layer: no relu
    # Exact-width store: only the real output columns ever hit VMEM/HBM.
    o_ref[...] = h.astype(o_ref.dtype)


def mlp_pallas(x, weights, biases, *, tm=512, compute_dtype=jnp.bfloat16):
    """x: (batch, seq, input_dim); weights[i]: (in_i, out_i); biases[i]: (out_i,)."""
    num_layers = len(weights)
    batch, seq, input_dim = x.shape
    output_dim = weights[-1].shape[1]

    rows = batch * seq
    row_quantum = 16   # bf16 sublane packing of the activation tile

    # Row tile: as big as possible (fewer, larger grid steps), multiple of 16.
    tm_eff = min(tm, _round_up(rows, row_quantum))
    if _num_tensorcores() >= 2:
        steps = pl.cdiv(rows, tm_eff)
        if steps < 2 and rows >= 2 * row_quantum:
            # Give both TensorCores work on the single "parallel" axis.
            tm_eff = max(row_quantum, _round_up(pl.cdiv(rows, 2), row_quantum))
        elif steps > 2 and steps % 2 == 1:
            # Prefer an even step count so the two cores get equal shares.
            tm_eff = max(row_quantum, _round_up(pl.cdiv(rows, steps + 1), row_quantum))
    grid = (pl.cdiv(rows, tm_eff),)

    # No row padding, no output slicing: Pallas clips the ragged last block
    # (unspecified rows in the clipped input block never reach a kept output
    # row).  The reshape below is free (row-major merge of leading dims).
    x2d = x.reshape(rows, input_dim)          # stays f32; cast happens in-kernel

    # Cast weights to bf16 once (not per grid step); biases stay f32 for the
    # f32 epilogue.  No column padding anywhere.
    ws = [w.astype(compute_dtype) for w in weights]
    bs = [b.reshape(1, -1).astype(jnp.float32) for b in biases]

    # x tile walks down the token axis; parameters are full-array blocks with
    # a constant index_map -> resident in VMEM across the whole grid (a few
    # KiB for this module; a large-hidden variant would tile K/N instead).
    in_specs = [pl.BlockSpec((tm_eff, input_dim), lambda i: (i, 0))]
    flat_params = []
    for w, b in zip(ws, bs):
        in_specs.append(pl.BlockSpec(w.shape, lambda i: (0, 0)))
        in_specs.append(pl.BlockSpec(b.shape, lambda i: (0, 0)))
        flat_params.extend([w, b])

    # Exact-width output block (last dim == full array dim): HBM write traffic
    # is only the real output bytes (no 128-column f32 write amplification).
    out_specs = pl.BlockSpec((tm_eff, output_dim), lambda i: (i, 0))

    param_bytes = sum(int(p.size) * p.dtype.itemsize for p in flat_params)
    x_bytes = rows * input_dim * x.dtype.itemsize
    o_bytes = rows * output_dim * jnp.dtype(x.dtype).itemsize
    flops = 2 * rows * sum(int(w.shape[0]) * int(w.shape[1]) for w in ws)

    # VMEM request: double-buffered tiles + resident params + headroom,
    # capped well below v7x's 64 MiB physical VMEM.
    tile_bytes = tm_eff * (input_dim + output_dim) * 4
    vmem_limit = min(32 * 1024 * 1024,
                     max(8 * 1024 * 1024,
                         4 * tile_bytes + 2 * param_bytes + (2 << 20)))

    kernel = functools.partial(_mlp_kernel, num_layers)
    out2d = pl.pallas_call(
        kernel,
        grid=grid,
        in_specs=in_specs,
        out_specs=out_specs,
        out_shape=jax.ShapeDtypeStruct((rows, output_dim), x.dtype),
        compiler_params=pltpu.CompilerParams(
            dimension_semantics=("parallel",),
            vmem_limit_bytes=int(vmem_limit),
        ),
        cost_estimate=pl.CostEstimate(
            flops=flops, transcendentals=0,
            bytes_accessed=x_bytes + param_bytes + o_bytes,
        ),
    )(x2d, *flat_params)

    return out2d.reshape(batch, seq, output_dim)


def mlp_reference_f32(x2d, weights, biases):
    """Pure f32 reference (PyTorch semantics)."""
    h = x2d.astype(jnp.float32)
    n = len(weights)
    for i, (w, b) in enumerate(zip(weights, biases)):
        h = h @ w.astype(jnp.float32) + b.astype(jnp.float32)
        if i < n - 1:
            h = jnp.maximum(h, 0.0)
    return h.astype(x2d.dtype)


def mlp_reference_mixed(x2d, weights, biases):
    """Precision-matched reference: bf16 matmul operands, f32 accumulation."""
    h = x2d.astype(jnp.bfloat16)
    n = len(weights)
    for i, (w, b) in enumerate(zip(weights, biases)):
        acc = jnp.dot(h, w.astype(jnp.bfloat16), preferred_element_type=jnp.float32)
        acc = acc + b.astype(jnp.float32)
        if i < n - 1:
            h = jnp.maximum(acc, 0.0).astype(jnp.bfloat16)
        else:
            h = acc
    return h.astype(x2d.dtype)


if __name__ == "__main__":
    # MLP(input_dim=16, hidden_dim=32, output_dim=16, num_layers=3)
    input_dim, hidden_dim, output_dim, num_layers = 16, 32, 16, 3
    batch, seq = 2, 8

    key = jax.random.PRNGKey(0)
    dims = [input_dim] + [hidden_dim] * (num_layers - 1) + [output_dim]

    weights, biases = [], []
    for li in range(num_layers):
        key, kw, kb = jax.random.split(key, 3)
        fan_in, fan_out = dims[li], dims[li + 1]
        # Deterministic synthetic init (shapes match nn.Linear(fan_in, fan_out)).
        w = jax.random.normal(kw, (fan_in, fan_out), jnp.float32) * (1.0 / fan_in**0.5)
        b = jax.random.normal(kb, (fan_out,), jnp.float32) * 0.01
        weights.append(w)
        biases.append(b)

    key, kx = jax.random.split(key)
    x = jax.random.normal(kx, (batch, seq, input_dim), jnp.float32)

    out = mlp_pallas(x, weights, biases)
    out = jax.block_until_ready(out)
    assert out.shape == (batch, seq, output_dim), out.shape

    x2d = x.reshape(-1, input_dim)
    ref_mixed = mlp_reference_mixed(x2d, weights, biases).reshape(batch, seq, output_dim)
    ref_f32 = mlp_reference_f32(x2d, weights, biases).reshape(batch, seq, output_dim)

    # Tight check vs. the precision-matched (bf16 operand, f32 accum) reference.
    err_mixed = float(jnp.max(jnp.abs(out - ref_mixed)))
    assert jnp.allclose(out, ref_mixed, atol=1e-3, rtol=1e-3), err_mixed
    # Loose sanity check vs. the pure-f32 PyTorch-semantics reference
    # (bf16 MXU operands introduce ~1e-2-scale deviation, as expected).
    err_f32 = float(jnp.max(jnp.abs(out - ref_f32)))
    assert jnp.allclose(out, ref_f32, atol=1e-1, rtol=1e-1), err_f32

    print("KERNEL_OK")
</pallas_src>

<mosaic_0001>
module attributes {stable_mosaic.version = 11 : i64} {
  func.func @_mlp_kernel(%arg0: i32, %arg1: memref<16x16xf32, #tpu.memory_space<vmem>>, %arg2: memref<16x32xbf16, #tpu.memory_space<vmem>>, %arg3: memref<1x32xf32, #tpu.memory_space<vmem>>, %arg4: memref<32x32xbf16, #tpu.memory_space<vmem>>, %arg5: memref<1x32xf32, #tpu.memory_space<vmem>>, %arg6: memref<32x16xbf16, #tpu.memory_space<vmem>>, %arg7: memref<1x16xf32, #tpu.memory_space<vmem>>, %arg8: memref<16x16xf32, #tpu.memory_space<vmem>>) attributes {dimension_semantics = [#tpu.dimension_semantics<parallel>], iteration_bounds = array<i64: 1>, scalar_prefetch = 0 : i64, scratch_operands = 0 : i64, tpu.core_type = #tpu.core_type<tc>, window_params = [{transform_indices = @transform_0, window_bounds = array<i64: 16, 16>}, {pipeline_mode = #tpu.pipeline_mode<synchronous>, transform_indices = @transform_1, window_bounds = array<i64: 16, 32>}, {pipeline_mode = #tpu.pipeline_mode<synchronous>, transform_indices = @transform_2, window_bounds = array<i64: 1, 32>}, {pipeline_mode = #tpu.pipeline_mode<synchronous>, transform_indices = @transform_3, window_bounds = array<i64: 32, 32>}, {pipeline_mode = #tpu.pipeline_mode<synchronous>, transform_indices = @transform_4, window_bounds = array<i64: 1, 32>}, {pipeline_mode = #tpu.pipeline_mode<synchronous>, transform_indices = @transform_5, window_bounds = array<i64: 32, 16>}, {pipeline_mode = #tpu.pipeline_mode<synchronous>, transform_indices = @transform_6, window_bounds = array<i64: 1, 16>}, {transform_indices = @transform_7, window_bounds = array<i64: 16, 16>}]} {
    %c0 = arith.constant 0 : index
    %c0_0 = arith.constant 0 : index
    %0 = vector.load %arg1[%c0, %c0_0] : memref<16x16xf32, #tpu.memory_space<vmem>>, vector<16x16xf32>
    %1 = arith.truncf %0 : vector<16x16xf32> to vector<16x16xbf16>
    %c0_1 = arith.constant 0 : index
    %c0_2 = arith.constant 0 : index
    %2 = vector.load %arg2[%c0_1, %c0_2] : memref<16x32xbf16, #tpu.memory_space<vmem>>, vector<16x32xbf16>
    %c0_3 = arith.constant 0 : index
    %c0_4 = arith.constant 0 : index
    %3 = vector.load %arg3[%c0_3, %c0_4] : memref<1x32xf32, #tpu.memory_space<vmem>>, vector<1x32xf32>
    %cst = arith.constant dense<0.000000e+00> : vector<16x32xf32>
    %4 = tpu.matmul %1, %2, %cst {dimension_numbers = #tpu.dot_dimension_numbers<[1], [0], [0], [1], [0, 0, 1, 1], [], []>} : vector<16x16xbf16>, vector<16x32xbf16>, vector<16x32xf32> -> vector<16x32xf32>
    %5 = vector.broadcast %3 : vector<1x32xf32> to vector<16x32xf32>
    %6 = arith.addf %4, %5 : vector<16x32xf32>
    %cst_5 = arith.constant 0.000000e+00 : f32
    %7 = vector.broadcast %cst_5 : f32 to vector<16x32xf32>
    %8 = arith.maximumf %6, %7 : vector<16x32xf32>
    %9 = arith.truncf %8 : vector<16x32xf32> to vector<16x32xbf16>
    %c0_6 = arith.constant 0 : index
    %c0_7 = arith.constant 0 : index
    %10 = vector.load %arg4[%c0_6, %c0_7] : memref<32x32xbf16, #tpu.memory_space<vmem>>, vector<32x32xbf16>
    %c0_8 = arith.constant 0 : index
    %c0_9 = arith.constant 0 : index
    %11 = vector.load %arg5[%c0_8, %c0_9] : memref<1x32xf32, #tpu.memory_space<vmem>>, vector<1x32xf32>
    %cst_10 = arith.constant dense<0.000000e+00> : vector<16x32xf32>
    %12 = tpu.matmul %9, %10, %cst_10 {dimension_numbers = #tpu.dot_dimension_numbers<[1], [0], [0], [1], [0, 0, 1, 1], [], []>} : vector<16x32xbf16>, vector<32x32xbf16>, vector<16x32xf32> -> vector<16x32xf32>
    %13 = vector.broadcast %11 : vector<1x32xf32> to vector<16x32xf32>
    %14 = arith.addf %12, %13 : vector<16x32xf32>
    %cst_11 = arith.constant 0.000000e+00 : f32
    %15 = vector.broadcast %cst_11 : f32 to vector<16x32xf32>
    %16 = arith.maximumf %14, %15 : vector<16x32xf32>
    %17 = arith.truncf %16 : vector<16x32xf32> to vector<16x32xbf16>
    %c0_12 = arith.constant 0 : index
    %c0_13 = arith.constant 0 : index
    %18 = vector.load %arg6[%c0_12, %c0_13] : memref<32x16xbf16, #tpu.memory_space<vmem>>, vector<32x16xbf16>
    %c0_14 = arith.constant 0 : index
    %c0_15 = arith.constant 0 : index
    %19 = vector.load %arg7[%c0_14, %c0_15] : memref<1x16xf32, #tpu.memory_space<vmem>>, vector<1x16xf32>
    %cst_16 = arith.constant dense<0.000000e+00> : vector<16x16xf32>
    %20 = tpu.matmul %17, %18, %cst_16 {dimension_numbers = #tpu.dot_dimension_numbers<[1], [0], [0], [1], [0, 0, 1, 1], [], []>} : vector<16x32xbf16>, vector<32x16xbf16>, vector<16x16xf32> -> vector<16x16xf32>
    %21 = vector.broadcast %19 : vector<1x16xf32> to vector<16x16xf32>
    %22 = arith.addf %20, %21 : vector<16x16xf32>
    %c0_17 = arith.constant 0 : index
    %c0_18 = arith.constant 0 : index
    %23 = vector.load %arg8[%c0_17, %c0_18] : memref<16x16xf32, #tpu.memory_space<vmem>>, vector<16x16xf32>
    tpu.vector_store %arg8[%c0_17, %c0_18], %22 {strides = array<i32>} : memref<16x16xf32, #tpu.memory_space<vmem>>, vector<16x16xf32>,
    return
  }
  func.func @transform_0(%arg0: i32) -> (i32, i32) {
    %c0_i32 = arith.constant 0 : i32
    %c0_i32_0 = arith.constant 0 : i32
    return %arg0, %c0_i32 : i32, i32
  }
  func.func @transform_1(%arg0: i32) -> (i32, i32) {
    %c0_i32 = arith.constant 0 : i32
    %c0_i32_0 = arith.constant 0 : i32
    %c0_i32_1 = arith.constant 0 : i32
    return %c0_i32, %c0_i32_0 : i32, i32
  }
  func.func @transform_2(%arg0: i32) -> (i32, i32) {
    %c0_i32 = arith.constant 0 : i32
    %c0_i32_0 = arith.constant 0 : i32
    %c0_i32_1 = arith.constant 0 : i32
    return %c0_i32, %c0_i32_0 : i32, i32
  }
  func.func @transform_3(%arg0: i32) -> (i32, i32) {
    %c0_i32 = arith.constant 0 : i32
    %c0_i32_0 = arith.constant 0 : i32
    %c0_i32_1 = arith.constant 0 : i32
    return %c0_i32, %c0_i32_0 : i32, i32
  }
  func.func @transform_4(%arg0: i32) -> (i32, i32) {
    %c0_i32 = arith.constant 0 : i32
    %c0_i32_0 = arith.constant 0 : i32
    %c0_i32_1 = arith.constant 0 : i32
    return %c0_i32, %c0_i32_0 : i32, i32
  }
  func.func @transform_5(%arg0: i32) -> (i32, i32) {
    %c0_i32 = arith.constant 0 : i32
    %c0_i32_0 = arith.constant 0 : i32
    %c0_i32_1 = arith.constant 0 : i32
    return %c0_i32, %c0_i32_0 : i32, i32
  }
  func.func @transform_6(%arg0: i32) -> (i32, i32) {
    %c0_i32 = arith.constant 0 : i32
    %c0_i32_0 = arith.constant 0 : i32
    %c0_i32_1 = arith.constant 0 : i32
    return %c0_i32, %c0_i32_0 : i32, i32
  }
  func.func @transform_7(%arg0: i32) -> (i32, i32) {
    %c0_i32 = arith.constant 0 : i32
    %c0_i32_0 = arith.constant 0 : i32
    return %arg0, %c0_i32 : i32, i32
  }
}

</mosaic_0001>

<bundles_post_ra>
// kernel: tpu_custom_call.1
= control target key start
LH: loop header
LB: loop body
LE: loop exit
PB: predicated region body
PF: predicated region fallthrough
CT: control target
= control target key end

     0   :  { %12 = vsyncpa [#allocation3], 0  ;;  %s483_s0 = inlined_call_operand.vmem [shape: f32[16,16], index: 0, kind: input, shape index: {}]   ;;  %s484_s1 = inlined_call_operand.vmem [shape: bf16[16,32], index: 1, kind: input, shape index: {}]   ;;  %s485_s2 = inlined_call_operand.vmem [shape: f32[1,32], index: 2, kind: input, shape index: {}]   ;;  %s486_s3 = inlined_call_operand.hbm [shape: bf16[32,32], index: 3, kind: input, shape index: {}]   ;;  %s487_s4 = inlined_call_operand.hbm [shape: f32[1,32], index: 4, kind: input, shape index: {}]   ;;  %s488_s5 = inlined_call_operand.vmem [shape: bf16[32,16], index: 5, kind: input, shape index: {}]   ;;  %s489_s6 = inlined_call_operand.vmem [shape: f32[1,16], index: 6, kind: input, shape index: {}]   ;;  %s490_s7 = inlined_call_operand.hbm [shape: f32[16,16], index: 7, kind: output, shape index: {}]  }
   0x1   :  { %13 = vsyncpa [#allocation6], 0 }
   0x2   :  { %14 = vsyncpa [#allocation4], 0  ;;  %s399_s24 = smov [#allocation2]  }
   0x3   :  { %s26_s25 = sshll.u32 %s399_s24, 4  ;;  %s27_s25 = int_to_ptr.vmem [resolvable:$true] %s26_s25 }
   0x4   :  { %s341_s26 = scalar_lea.vmem %s27_s25, 256  ;;  %p346_p1 = scmp.lt.s32.totalorder %s27_s25, %s27_s25 }
   0x5   :  { %p342_p0 = scmp.ne.s32.totalorder %s27_s25, %s341_s26  ;;  %p347_p2 = scmp.lt.s32.totalorder %s341_s26, %s341_s26 }
   0x7   :  { %p348_p3 = por %p347_p2, %p346_p1 }
   0x9   :  { %p349_p4 = pnand %p348_p3, %p342_p0 }
   0xb   :  { %352 = shalt.err (!%p349_p4)
}
   0xc   :  { %s400_s27 = smov 64   ;;  %s401_s28 = smov 4  }
   0xd   :  { %32 = dma.hbm_to_vmem [thread:$0]  %s486_s3, 256, %s27_s25, [#allocation3], %s400_s27, %s400_s27, %s401_s28  }
   0xe   :  { %s402_s8 = smov [#allocation5]  }
   0xf   :  { %s39_s9 = sshll.u32 %s402_s8, 4  ;;  %s40_s9 = int_to_ptr.vmem [resolvable:$true] %s39_s9 }
  0x10   :  { %s361_s10 = scalar_lea.vmem %s40_s9, 16  ;;  %s365_s11 = scalar_lea.vmem %s40_s9, 32 }
  0x11   :  { %p362_p5 = scmp.ne.s32.totalorder %s40_s9, %s361_s10  ;;  %p366_p6 = scmp.lt.s32.totalorder %s40_s9, %s40_s9 }
  0x12   :  { %p367_p7 = scmp.lt.s32.totalorder %s365_s11, %s361_s10 }
  0x14   :  { %p368_p8 = por %p367_p7, %p366_p6 }
  0x16   :  { %p369_p9 = pnand %p368_p8, %p362_p5 }
  0x18   :  { %372 = shalt.err (!%p369_p9)
}
  0x19   :  { %42 = dma.hbm_to_vmem [thread:$0]  %s487_s4, 16, %s40_s9, [#allocation6]  }
  0x1a   :  { %393 = dma.done.wait [#allocation3], 256  }
  0x1b   :  { %394 = vsyncadd [#allocation3], 4294967040 }
  0x1c   :  { %395 = dma.done.wait [#allocation6], 16  }
  0x1d   :  { %396 = vsyncadd [#allocation6], 4294967280  ;;  %v403_v0 = vmov 0.0   ;;  %vm404_vm0 = vmmov 0   ;;  %v328_v1 = vld [vmem:[%s484_s1] sm:$0xff]   ;;  %v55_v3 = vld [vmem:[%s483_s0 + $0x8] sm:$0xff] }
  0x1e   :  { %297 = vmatprep.subr.bf16.mxu0 %v403_v0  ;;  %299 = vmatprep.mubr.msk.bf16.mxu0 %vm404_vm0, %v403_v0  ;;  %v54_v2 = vld [vmem:[%s483_s0] sm:$0xff]  ;;  %vm72_vm1 = vcmask 130048   ;;  %v329_v5 = vld [vmem:[#allocation2 + $0x8] sm:$0xff]   ;;  %vm143_vm2 = vcmask 261120   ;;  %v281_v19 = vld [vmem:[#allocation5] ss:$0 sm:$0xff] }
  0x1f   :  { %303 = vmatprep.subr.bf16.mxu1 %v403_v0  ;;  %307 = vmatprep.mubr.msk.bf16.mxu1 %vm404_vm0, %v403_v0  ;;  %v56_v4 = vpack.c.bf16 %v55_v3, %v54_v2  ;;  %v330_v6 = vld [vmem:[#allocation2] sm:$0xff]   ;;  %v331_v17 = vld [vmem:[%s488_s5 + $0x8] sm:$0xff]  }
  0x20   :  { %298 = vmatpush3.bf16.msra.mxu0 %v328_v1  ;;  %304 = vmatpush3.bf16.msra.mxu1 %v329_v5  ;;  %v278_v7 = vld [vmem:[%s485_s2] ss:$0 sm:$0xff] }
  0x21   :  { %311 = vmatprep.subr.bf16.mxu0 %v403_v0  ;;  %305 = vmatprep.subr.bf16.mxu1 %v403_v0  ;;  %v332_v18 = vld [vmem:[%s488_s5] sm:$0xff]   ;;  %s405_s5 = smov [#allocation7]  }
  0x22   :  { %v285_v29 = vld [vmem:[%s489_s6] ss:$0 sm:$0xff]  ;;  %s265_s23 = sshll.u32 %s405_s5, 4  ;;  %s266_s23 = int_to_ptr.vmem [resolvable:$true] %s265_s23 }
  0x23   :  { %300 = vmatmul.mubr.msk.bf16.vlgmr.msra.gmra.mxu0 %vm72_vm1, %v56_v4  ;;  %s373_s24 = scalar_lea.vmem %s266_s23, 256  ;;  %p378_p11 = scmp.lt.s32.totalorder %s266_s23, %s266_s23 }
  0x24   :  { %315 = vmatprep.mubr.msk.bf16.mxu0 %vm404_vm0, %v403_v0  ;;  %306 = vmatpush3.bf16.msra.mxu1 %v330_v6  ;;  %p374_p10 = scmp.ne.s32.totalorder %s266_s23, %s373_s24  ;;  %p379_p12 = scmp.lt.s32.totalorder %s373_s24, %s373_s24 }
  0x25   :  { %312 = vmatpush3.bf16.msra.mxu0 %v331_v17 }
  0x26   :  { %313 = vmatprep.subr.bf16.mxu0 %v403_v0  ;;  %p380_p13 = por %p379_p12, %p378_p11 }
  0x28   :  { %p381_p0 = pnand %p380_p13, %p374_p10 }
  0x29   :  { %314 = vmatpush3.bf16.msra.mxu0 %v332_v18 }
  0xe3   :  { %v110_v8 = vpop.f32.mrf.mxu0 }
  0xe4   :  { %v111_v10 = vadd.f32 %v278_v7, %v110_v8 }
  0xe5   :  { %v301_v9 = vpop.f32.mrf.mxu0 }
  0xe6   :  { %v117_v14 = vmax.f32 %v111_v10, 0.0 }
  0xe7   :  { %v113_v11 = vpop.f32.mrf.mxu0 }
  0xe8   :  { %v114_v12 = vadd.f32 %v278_v7, %v113_v11 }
  0xe9   :  { %v302_v13 = vpop.f32.mrf.mxu0 }
  0xea   :  { %v118_v15 = vmax.f32 %v114_v12, 0.0 }
  0xec   :  { %v119_v16 = vpack.c.bf16 %v118_v15, %v117_v14 }
  0xee   :  { %308 = vmatmul.mubr.msk.bf16.vlgmr.msra.gmra.mxu1 %vm143_vm2, %v119_v16 }
 0x1ae   :  { %v181_v20 = vpop.f32.mrf.mxu1 }
 0x1af   :  { %v182_v22 = vadd.f32 %v281_v19, %v181_v20 }
 0x1b0   :  { %v309_v21 = vpop.f32.mrf.mxu1 }
 0x1b1   :  { %v188_v26 = vmax.f32 %v182_v22, 0.0 }
 0x1b2   :  { %v184_v23 = vpop.f32.mrf.mxu1 }
 0x1b3   :  { %v185_v24 = vadd.f32 %v281_v19, %v184_v23 }
 0x1b4   :  { %v310_v25 = vpop.f32.mrf.mxu1 }
 0x1b5   :  { %v189_v27 = vmax.f32 %v185_v24, 0.0 }
 0x1b7   :  { %v190_v28 = vpack.c.bf16 %v189_v27, %v188_v26 }
 0x1b9   :  { %316 = vmatmul.mubr.msk.bf16.vlgmr.msra.gmra.mxu0 %vm143_vm2, %v190_v28 }
 0x279   :  { %v251_v30 = vpop.f32.mrf.mxu0 }
 0x27a   :  { %v252_v31 = vadd.f32 %v285_v29, %v251_v30 }
 0x27b   :  { %v317_v32 = vpop.f32.mrf.mxu0 }
 0x27c   :  { %258 = vst.msk [vmem:[#allocation7] sm:$0xff] %vm72_vm1, %v252_v31 }
 0x27d   :  { %v254_v33 = vpop.f32.mrf.mxu0 }
 0x27e   :  { %v255_v34 = vadd.f32 %v285_v29, %v254_v33 }
 0x27f   :  { %v318_v35 = vpop.f32.mrf.mxu0 }
 0x280   :  { %259 = vst.msk [vmem:[#allocation7 + $0x8] sm:$0xff] %vm72_vm1, %v255_v34 }
 0x281   :  { %384 = shalt.err (!%p381_p0)
}
 0x282   :  { %s406_s6 = smov 128   ;;  %s407_s25 = smov 8  }
 0x283   :  { %271 = dma.vmem_to_hbm [thread:$0]  %s266_s23, 256, %s490_s7, [#allocation4], %s406_s6, %s406_s6, %s407_s25  }
 0x284   :  { %397 = dma.done.wait [#allocation4], 256  }
 0x285   :  { %398 = vsyncadd [#allocation4], 4294967040 }
 0x286   :  { %275 = vsyncpa [#allocation3], 1 }
 0x287   :  { %276 = vsyncpa [#allocation6], 1 }
 0x288   :  { %277 = vsyncpa [#allocation4], 1 }

</bundles_post_ra>
